<compile_context>
chip_gen: v7x
topology: tpu7x:2x2x1
jax: 0.10.0
libtpu: 0.0.40
codegen_flags: <defaults>
</compile_context>

<pallas_src>
import jax
import jax.numpy as jnp
from jax.experimental import pallas as pl
from jax.experimental.pallas import tpu as pltpu


def _segment_line_kernel(x_ref, w1_ref, w2_ref, o_ref):
    # x_ref:  (1, C_in,  TP)  channels on sublanes, pixels on lanes
    # w1_ref: (C_in, C_in)    conv1 weight, natural (out, in) layout
    # w2_ref: (C_out, C_in)   conv2 weight, natural (out, in) layout
    # o_ref:  (1, C_out, TP)
    x = x_ref[0]                                               # (C_in, TP)
    h = jnp.dot(w1_ref[...], x, preferred_element_type=jnp.float32)
    h = jnp.maximum(h, 0.0)                                    # ReLU in f32
    h = h.astype(x.dtype)                                      # MXU-native input dtype
    y = jnp.dot(w2_ref[...], h, preferred_element_type=jnp.float32)
    o_ref[0] = y.astype(o_ref.dtype)


def _pick_pixel_tile(hw, per_pixel_tile_bytes, vmem_tile_budget):
    """Largest legal pixel tile: full plane if it fits the budget, otherwise the
    largest multiple of 128 that divides hw and fits the budget."""
    max_tp = max(vmem_tile_budget // max(per_pixel_tile_bytes, 1), 128)
    if hw <= max_tp:
        return hw                      # full-extent last dim is always legal
    tp = min((max_tp // 128) * 128, (hw // 128) * 128)
    while tp >= 128:
        if hw % tp == 0:
            return tp
        tp -= 128
    # TODO(synk): for huge planes with hw not a multiple of 128, pad the pixel
    # axis to a multiple of 128 instead of taking the whole plane in one block.
    return hw


def segment_line_forward(feature_nchw, w1, w2, *, compute_dtype=None,
                         vmem_tile_budget=24 << 20):
    """feature_nchw: (N, C_in, H, W); w1: (C_in, C_in); w2: (C_out, C_in).

    Weights are in the natural conv layout: w1[o, i] = conv1.weight[o, i, 0, 0].
    Returns (N, C_out, H, W) in the input dtype, matching the PyTorch module.
    compute_dtype: optional narrower dtype (e.g. bf16) for the DMA/matmul path;
    accumulation is always f32 on the MXU.
    """
    N, C_in, H, W = feature_nchw.shape
    C_out = w2.shape[0]
    HW = H * W
    out_dtype = feature_nchw.dtype
    if compute_dtype is None:
        compute_dtype = feature_nchw.dtype

    # NCHW -> (N, C_in, H*W): contiguous reshape, zero extra HBM traffic.
    x = feature_nchw.reshape(N, C_in, HW).astype(compute_dtype)
    w1c = w1.astype(compute_dtype)
    w2c = w2.astype(compute_dtype)

    in_bytes = jnp.dtype(compute_dtype).itemsize
    out_bytes = jnp.dtype(out_dtype).itemsize

    # Tile size: biggest pixel tile whose double-buffered in+out tiles fit the
    # VMEM budget (mem-bound kernel -> bigger tiles amortize per-step overhead).
    per_pixel_tile_bytes = 2 * (C_in * in_bytes + C_out * out_bytes)
    tp = _pick_pixel_tile(HW, per_pixel_tile_bytes, vmem_tile_budget)
    grid = (N, HW // tp)

    # Explicit VMEM limit (double-buffered tiles + resident weights) with 2x
    # headroom, capped well under v7x's 64 MiB per-TensorCore VMEM.
    vmem_need = (2 * (C_in * tp * in_bytes          # x tile (double-buffered)
                      + C_out * tp * out_bytes)     # out tile (double-buffered)
                 + C_in * C_in * in_bytes           # w1 (resident)
                 + C_out * C_in * in_bytes)         # w2 (resident)
    vmem_limit = int(min(max(2 * vmem_need, 8 << 20), 48 << 20))

    # Advisory cost estimate so XLA schedules neighbours sensibly.
    cost = pl.CostEstimate(
        flops=2 * N * HW * (C_in * C_in + C_in * C_out),
        transcendentals=0,
        bytes_accessed=(N * HW * (C_in * in_bytes + C_out * out_bytes)
                        + (C_in * C_in + C_out * C_in) * in_bytes),
    )

    out_flat = pl.pallas_call(
        _segment_line_kernel,
        out_shape=jax.ShapeDtypeStruct((N, C_out, HW), out_dtype),
        grid_spec=pltpu.PrefetchScalarGridSpec(
            num_scalar_prefetch=0,
            grid=grid,
            in_specs=[
                pl.BlockSpec((1, C_in, tp), lambda n, p: (n, 0, p)),  # x tile
                pl.BlockSpec((C_in, C_in), lambda n, p: (0, 0)),      # w1 (resident)
                pl.BlockSpec((C_out, C_in), lambda n, p: (0, 0)),     # w2 (resident)
            ],
            out_specs=pl.BlockSpec((1, C_out, tp), lambda n, p: (n, 0, p)),
        ),
        compiler_params=pltpu.CompilerParams(
            dimension_semantics=("parallel", "parallel"),
            vmem_limit_bytes=vmem_limit),
        cost_estimate=cost,
    )(x, w1c, w2c)

    return out_flat.reshape(N, C_out, H, W)


def _reference(feature_nchw, w1, w2):
    h = jnp.maximum(jnp.einsum("oc,nchw->nohw", w1, feature_nchw), 0.0)
    return jnp.einsum("oc,nchw->nohw", w2, h)


if __name__ == "__main__":
    key = jax.random.PRNGKey(0)
    k_x, k_w1, k_w2 = jax.random.split(key, 3)

    # Small shapes consistent with the module's forward (in_size=32, out_size=16).
    N, C_in, H, W = 2, 32, 16, 16
    C_out = 16

    feature = jax.random.normal(k_x, (N, C_in, H, W), dtype=jnp.float32)

    # Deterministic Kaiming-style init, natural conv (out, in) layout.
    w1 = jax.random.normal(k_w1, (C_in, C_in), dtype=jnp.float32) * (2.0 / C_in) ** 0.5
    w2 = jax.random.normal(k_w2, (C_out, C_in), dtype=jnp.float32) * (2.0 / C_in) ** 0.5

    ref = _reference(feature, w1, w2)

    # f32 path: matches the PyTorch module numerics.
    out = jax.block_until_ready(segment_line_forward(feature, w1, w2))
    assert out.shape == (N, C_out, H, W)
    assert jnp.allclose(out, ref, atol=1e-4, rtol=1e-4)

    # bf16 data-movement path (f32 accumulation); looser tolerance expected.
    out_bf16 = jax.block_until_ready(
        segment_line_forward(feature, w1, w2, compute_dtype=jnp.bfloat16))
    assert out_bf16.shape == (N, C_out, H, W)
    assert jnp.allclose(out_bf16, ref, atol=1.5e-1, rtol=5e-2)

    # Bigger, tiled spatial plane (exercises the pixel-tiling path).
    Hb = Wb = 64
    feat_big = jax.random.normal(k_x, (N, C_in, Hb, Wb), dtype=jnp.float32)
    ref_big = _reference(feat_big, w1, w2)
    out_big = jax.block_until_ready(segment_line_forward(feat_big, w1, w2))
    assert out_big.shape == (N, C_out, Hb, Wb)
    assert jnp.allclose(out_big, ref_big, atol=1e-4, rtol=1e-4)

    # Non-128-multiple plane (full-extent last-dim block path).
    Hs = Ws = 10
    feat_small = jax.random.normal(k_x, (N, C_in, Hs, Ws), dtype=jnp.float32)
    ref_small = _reference(feat_small, w1, w2)
    out_small = jax.block_until_ready(segment_line_forward(feat_small, w1, w2))
    assert out_small.shape == (N, C_out, Hs, Ws)
    assert jnp.allclose(out_small, ref_small, atol=1e-4, rtol=1e-4)

    print("KERNEL_OK")
</pallas_src>

<mosaic_0001>
module attributes {stable_mosaic.version = 11 : i64} {
  func.func @_segment_line_kernel(%arg0: i32, %arg1: i32, %arg2: memref<1x32x256xf32, #tpu.memory_space<vmem>>, %arg3: memref<32x32xf32, #tpu.memory_space<vmem>>, %arg4: memref<16x32xf32, #tpu.memory_space<vmem>>, %arg5: memref<1x16x256xf32, #tpu.memory_space<vmem>>) attributes {dimension_semantics = [#tpu.dimension_semantics<parallel>, #tpu.dimension_semantics<parallel>], iteration_bounds = array<i64: 2, 1>, scalar_prefetch = 0 : i64, scratch_operands = 0 : i64, tpu.core_type = #tpu.core_type<tc>, window_params = [{transform_indices = @transform_0, window_bounds = array<i64: 1, 32, 256>}, {pipeline_mode = #tpu.pipeline_mode<synchronous>, transform_indices = @transform_1, window_bounds = array<i64: 32, 32>}, {pipeline_mode = #tpu.pipeline_mode<synchronous>, transform_indices = @transform_2, window_bounds = array<i64: 16, 32>}, {transform_indices = @transform_3, window_bounds = array<i64: 1, 16, 256>}]} {
    %c0 = arith.constant 0 : index
    %c0_0 = arith.constant 0 : index
    %c0_1 = arith.constant 0 : index
    %0 = vector.load %arg2[%c0, %c0_0, %c0_1] : memref<1x32x256xf32, #tpu.memory_space<vmem>>, vector<1x32x256xf32>
    %1 = vector.shape_cast %0 : vector<1x32x256xf32> to vector<32x256xf32>
    %c0_2 = arith.constant 0 : index
    %c0_3 = arith.constant 0 : index
    %2 = vector.load %arg3[%c0_2, %c0_3] : memref<32x32xf32, #tpu.memory_space<vmem>>, vector<32x32xf32>
    %cst = arith.constant dense<0.000000e+00> : vector<32x256xf32>
    %3 = tpu.matmul %2, %1, %cst {dimension_numbers = #tpu.dot_dimension_numbers<[1], [0], [0], [1], [0, 0, 1, 1], [], []>} : vector<32x32xf32>, vector<32x256xf32>, vector<32x256xf32> -> vector<32x256xf32>
    %cst_4 = arith.constant 0.000000e+00 : f32
    %4 = vector.broadcast %cst_4 : f32 to vector<32x256xf32>
    %5 = arith.maximumf %3, %4 : vector<32x256xf32>
    %c0_5 = arith.constant 0 : index
    %c0_6 = arith.constant 0 : index
    %6 = vector.load %arg4[%c0_5, %c0_6] : memref<16x32xf32, #tpu.memory_space<vmem>>, vector<16x32xf32>
    %cst_7 = arith.constant dense<0.000000e+00> : vector<16x256xf32>
    %7 = tpu.matmul %6, %5, %cst_7 {dimension_numbers = #tpu.dot_dimension_numbers<[1], [0], [0], [1], [0, 0, 1, 1], [], []>} : vector<16x32xf32>, vector<32x256xf32>, vector<16x256xf32> -> vector<16x256xf32>
    %c0_8 = arith.constant 0 : index
    %c0_9 = arith.constant 0 : index
    %c0_10 = arith.constant 0 : index
    %8 = vector.load %arg5[%c0_8, %c0_9, %c0_10] : memref<1x16x256xf32, #tpu.memory_space<vmem>>, vector<1x16x256xf32>
    %9 = vector.shape_cast %8 : vector<1x16x256xf32> to vector<16x256xf32>
    %10 = vector.shape_cast %7 : vector<16x256xf32> to vector<1x16x256xf32>
    tpu.vector_store %arg5[%c0_8, %c0_9, %c0_10], %10 {strides = array<i32>} : memref<1x16x256xf32, #tpu.memory_space<vmem>>, vector<1x16x256xf32>,
    return
  }
  func.func @transform_0(%arg0: i32, %arg1: i32) -> (i32, i32, i32) {
    %c0_i32 = arith.constant 0 : i32
    %c0_i32_0 = arith.constant 0 : i32
    return %arg0, %c0_i32, %arg1 : i32, i32, i32
  }
  func.func @transform_1(%arg0: i32, %arg1: i32) -> (i32, i32) {
    %c0_i32 = arith.constant 0 : i32
    %c0_i32_0 = arith.constant 0 : i32
    %c0_i32_1 = arith.constant 0 : i32
    return %c0_i32, %c0_i32_0 : i32, i32
  }
  func.func @transform_2(%arg0: i32, %arg1: i32) -> (i32, i32) {
    %c0_i32 = arith.constant 0 : i32
    %c0_i32_0 = arith.constant 0 : i32
    %c0_i32_1 = arith.constant 0 : i32
    return %c0_i32, %c0_i32_0 : i32, i32
  }
  func.func @transform_3(%arg0: i32, %arg1: i32) -> (i32, i32, i32) {
    %c0_i32 = arith.constant 0 : i32
    %c0_i32_0 = arith.constant 0 : i32
    return %arg0, %c0_i32, %arg1 : i32, i32, i32
  }
}

</mosaic_0001>

<bundles_post_ra>
// kernel: tpu_custom_call.1
= control target key start
LH: loop header
LB: loop body
LE: loop exit
PB: predicated region body
PF: predicated region fallthrough
CT: control target
= control target key end

     0   :  { %8 = vsyncpa [#allocation3], 0  ;;  %s1171_s0 = inlined_call_operand.hbm [shape: f32[2,32,256], index: 0, kind: input, shape index: {}]   ;;  %s1172_s1 = inlined_call_operand.hbm [shape: f32[32,32], index: 1, kind: input, shape index: {}]   ;;  %s1173_s2 = inlined_call_operand.hbm [shape: f32[16,32], index: 2, kind: input, shape index: {}]   ;;  %s1174_s3 = inlined_call_operand.hbm [shape: f32[2,16,256], index: 3, kind: output, shape index: {}]  }
   0x1   :  { %10 = vsyncpa [#allocation3 + $0x1], 0 }
   0x2   :  { %11 = vsyncpa [#allocation6], 0 }
   0x3   :  { %12 = vsyncpa [#allocation4], 0 }
   0x4   :  { %14 = vsyncpa [#allocation4 + $0x1], 0  ;;  %s909_s12 = smov 0   ;;  %s911_s13 = smov 0  }
   0x5   :  { %s913_s14 = smov 0   ;;  %s915_s15 = smov 0  }
   0x6   :  { %s917_s16 = smov 0   ;;  %s919_s17 = smov 0  }
   0x7 LB: > { %s571_s18 = sadd.s32 4294967295, %s876_s17   ;;  %s572_s19 = sadd.s32 4294967294, %s876_s17   ;;  %s876_s17 = sphi %s919_s17, %s20_s17   ;;  %s872_s16 = sphi %s917_s16, %s1196_s16   ;;  %s868_s15 = sphi %s915_s15, %s1195_s15   ;;  %s864_s14 = sphi %s913_s14, %s1194_s14   ;;  %s860_s13 = sphi %s911_s13, %s1193_s13   ;;  %s856_s12 = sphi %s909_s12, %s1192_s12  }
   0x8   : > { %p54_p0 = scmp.ne.s32.totalorder %s860_s13, %s856_s12  ;;  %p943_p1 = scmp.eq.s32.totalorder %s571_s18, 0 }
   0x9   : > { %p947_p2 = scmp.eq.s32.totalorder %s571_s18, 1  ;;  %p128_p3 = scmp.eq.s32.totalorder %s572_s19, 1 }
   0xa   : > { %s1179_s20 = scalar_select %p943_p1, 1, 0 }
   0xb   : > { %p953_p4 = por %p943_p1, %p54_p0  ;;  %p573_p5 = scmp.ge.s32.totalorder %s876_s17, 1 }
   0xc   : > { %p958_p6 = por %p128_p3, %p54_p0  ;;  %p135_p7 = scmp.lt.s32.totalorder %s876_s17, 3 }
   0xd   : > { %s1181_s22 = scalar_select %p953_p4, 1, 0 }
   0xe   : > { %s1182_s23 = scalar_select %p958_p6, 1, 0 }
   0xf   : > { %p963_p8 = pnand %p573_p5, %p135_p7  ;;  %s878_s25 = smov [#allocation5]  }
  0x10   : > { %s147_s26 = sshll.u32 %s878_s25, 4  ;;  %s879_s28 = smov [#allocation7]   ;;  %s967_s26 = int_to_ptr.vmem [resolvable:$true] %s147_s26 }
  0x11   : > { %p626_p9 = pneg %p963_p8  ;;  %s160_s29 = sshll.u32 %s879_s28, 4  ;;  %s978_s29 = int_to_ptr.vmem [resolvable:$true] %s160_s29 }
  0x12   : > { %s704_s5 = scalar_lea.hbm %s1172_s1, 512 }
  0x13   : > { %p974_p11 = pnand %p626_p9, %p943_p1  ;;  %p705_p12 = scmp.ne.s32.totalorder %s1172_s1, %s704_s5 }
  0x14   : > { %p711_p5 = scmp.lt.u32.totalorder %s704_s5, %s1172_s1 }
  0x15   : > { %p706_p13 = pneg %p974_p11 }
  0x17   : > { %p707_p0 = pnand %p706_p13, %p705_p12 }
  0x19   : > { %p708_p3 = pneg %p707_p0 }
  0x1b   : > { %p713_p7 = pnand %p711_p5, %p708_p3 }
  0x1d   : > { %716 = shalt.err (!%p713_p7)
}
  0x1e   : > { %s717_s10 = scalar_lea.vmem %s967_s26, 512  ;;  %p725_p1 = scmp.lt.s32.totalorder %s967_s26, %s967_s26 }
  0x1f   : > { %p718_p9 = scmp.ne.s32.totalorder %s967_s26, %s717_s10  ;;  %p726_p12 = scmp.lt.s32.totalorder %s717_s10, %s717_s10 }
  0x21   : > { %p720_p10 = pnand %p718_p9, %p706_p13  ;;  %p727_p0 = por %p726_p12, %p725_p1 }
  0x23   : > { %p721_p6 = pneg %p720_p10 }
  0x25   : > { %p728_p4 = pnand %p727_p0, %p721_p6 }
  0x27   : > { %731 = shalt.err (!%p728_p4)
}
  0x28   : > { %s880_s11 = smov 128   ;;  %s881_s18 = smov 8  }
  0x29   : > { %629 = dma.hbm_to_vmem [thread:$0]  (!%p974_p11), %s1172_s1, 512, %s967_s26, [#allocation6], %s880_s11, %s880_s11, %s881_s18  }
  0x2a   : > { %s732_s4 = scalar_lea.hbm %s1173_s2, 256 }
  0x2b   : > { %p733_p1 = scmp.ne.s32.totalorder %s1173_s2, %s732_s4  ;;  %p739_p10 = scmp.lt.u32.totalorder %s732_s4, %s1173_s2 }
  0x2d   : > { %p735_p4 = pnand %p733_p1, %p706_p13 }
  0x2f   : > { %p736_p6 = pneg %p735_p4 }
  0x31   : > { %p741_p3 = pnand %p739_p10, %p736_p6 }
  0x33   : > { %744 = shalt.err (!%p741_p3)
}
  0x34   : > { %s745_s26 = scalar_lea.vmem %s978_s29, 256  ;;  %p753_p12 = scmp.lt.s32.totalorder %s978_s29, %s978_s29 }
  0x35   : > { %p746_p5 = scmp.ne.s32.totalorder %s978_s29, %s745_s26  ;;  %p754_p0 = scmp.lt.s32.totalorder %s745_s26, %s745_s26 }
  0x37   : > { %p748_p7 = pnand %p746_p5, %p706_p13  ;;  %p755_p1 = por %p754_p0, %p753_p12 }
  0x39   : > { %p749_p9 = pneg %p748_p7 }
  0x3b   : > { %p756_p4 = pnand %p755_p1, %p749_p9 }
  0x3d   : > { %759 = shalt.err (!%p756_p4)
}
  0x3e   : > { %632 = dma.hbm_to_vmem [thread:$0]  (!%p974_p11), %s1173_s2, 256, %s978_s29, [#allocation6], %s880_s11, %s880_s11, %s881_s18  }
  0x3f   : > { %s32_s19 = sadd.s32 1, %s872_s16  ;;  %s41_s25 = sadd.s32 1, %s864_s14 }
  0x40   : > { %p34_p13 = scmp.ge.s32.totalorder %s32_s19, 2  ;;  %p48_p6 = scmp.ne.s32.totalorder %s864_s14, %s860_s13 }
  0x41   : > { %p49_p10 = scmp.eq.s32.totalorder %s876_s17, 0  ;;  %p643_p3 = scmp.lt.s32.totalorder %s876_s17, 2 }
  0x42   : > { %s1198_s19 = smov (%p34_p13, %s32_s19), 0  ;;  %p1042_p7 = por %p947_p2, %p48_p6 }
  0x43   : > { %p50_p5 = por %p49_p10, %p48_p6  ;;  %s36_s28 = ssub.s32 %s872_s16, %s1198_s19 }
  0x44   : > { %s1185_s27 = scalar_select %p1042_p7, 1, 0 }
  0x45   : > { %s174_s30 = sand.u32 1, %s864_s14   ;;  %p39_p9 = scmp.eq.s32.totalorder %s36_s28, 0 }
  0x46   : > { %s577_s29 = sshll.u32 %s174_s30, 6  ;;  %s596_s11 = sshll.u32 %s872_s16, 10 }
  0x47   : > { %s1051_s18 = scalar_select %p39_p9, %s864_s14, %s41_s25  }
  0x48   : > { %s1056_s6 = scalar_lea.hbm %s1171_s0, %s596_s11  ;;  %s178_s21 = scalar_lea.vmem [#allocation2], %s577_s29 }
  0x49   : > { %s187_s7 = sshll.u32 %s178_s21, 4  ;;  %p1060_p2 = pnand %p643_p3, %p50_p5  ;;  %s1064_s7 = int_to_ptr.vmem [resolvable:$true] %s187_s7 }
  0x4a   : > { %s1066_s26 = scalar_lea.sflag [#allocation3], %s174_s30  ;;  %s760_s9 = scalar_lea.hbm %s1056_s6, 1024 }
  0x4b   : > { %p761_p11 = scmp.ne.s32.totalorder %s1056_s6, %s760_s9  ;;  %p762_p12 = pneg %p1060_p2 }
  0x4c   : > { %s765_s28 = scalar_lea.hbm %s1171_s0, 2048  ;;  %p766_p4 = scmp.lt.u32.totalorder %s1056_s6, %s1171_s0 }
  0x4d   : > { %p763_p0 = pnand %p762_p12, %p761_p11  ;;  %p767_p13 = scmp.lt.u32.totalorder %s765_s28, %s760_s9 }
  0x4e   : > { %p769_p10 = scmp.lt.u32.totalorder %s760_s9, %s1056_s6 }
  0x4f   : > { %p764_p1 = pneg %p763_p0  ;;  %p768_p6 = por %p767_p13, %p766_p4 }
  0x51   : > { %p770_p3 = por %p769_p10, %p768_p6 }
  0x53   : > { %p771_p5 = pnand %p770_p3, %p764_p1 }
  0x55   : > { %774 = shalt.err (!%p771_p5)
}
  0x56   : > { %s775_s30 = scalar_lea.vmem %s1064_s7, 1024  ;;  %s882_s4 = smov [#allocation2]  }
  0x57   : > { %p776_p9 = scmp.ne.s32.totalorder %s1064_s7, %s775_s30  ;;  %s780_s5 = sshll.u32 %s882_s4, 4  ;;  %s781_s5 = int_to_ptr.vmem [resolvable:$false] %s780_s5 }
  0x58   : > { %s782_s21 = scalar_lea.vmem %s781_s5, 2048  ;;  %p783_p7 = scmp.lt.s32.totalorder %s1064_s7, %s781_s5 }
  0x59   : > { %p778_p11 = pnand %p776_p9, %p762_p12  ;;  %p784_p4 = scmp.lt.s32.totalorder %s782_s21, %s775_s30 }
  0x5b   : > { %p779_p0 = pneg %p778_p11  ;;  %p785_p13 = por %p784_p4, %p783_p7 }
  0x5d   : > { %p786_p6 = pnand %p785_p13, %p779_p0 }
  0x5f   : > { %789 = shalt.err (!%p786_p6)
}
  0x60   : > { %s883_s9 = smov 256   ;;  %s884_s10 = smov 16  }
  0x61   : > { %636 = dma.hbm_to_vmem [thread:$0]  (!%p1060_p2), %s1056_s6, 1024, %s1064_s7, %s1066_s26, %s883_s9, %s883_s9, %s884_s10  }
  0x62   : > { %199 = sbr.rel (%p963_p8) target bundleno = 585 (0x249), region = 32  ;;  %s1097_s25 = sand.u32 (!%p963_p8), 1, %s860_s13  }
  0x63   : > { %s581_s28 = sshll.u32 (!%p963_p8), %s1097_s25, 6  ;;  %s202_s29 = scalar_lea.sflag (!%p963_p8), [#allocation3], %s1097_s25 }
  0x64   : > { %s205_s11 = scalar_lea.vmem (!%p963_p8), [#allocation2], %s581_s28  ;;  %p1187_p7 = scmp.ne.s32.totalorder (!%p963_p8), %s1181_s22, 0 }
  0x69   : > { %843 = dma.done.wait (%p1187_p7), %s202_s29, 1024  }
  0x6a   : > { %845 = vsyncadd (%p1187_p7), %s202_s29, 4294966272  ;;  %p1188_p12 = scmp.ne.s32.totalorder %s1179_s20, 0 }
  0x6c   : > { %847 = dma.done.wait (%p1188_p12), [#allocation6], 768  }
  0x6d   : > { %849 = vsyncadd (%p1188_p12), [#allocation6], 4294966528  ;;  %v885_v0 = vmov 0.0   ;;  %v239_v1 = vld [vmem:[%s205_s11 + $0x8] sm:$0xff]  ;;  %v241_v2 = vld [vmem:[%s205_s11 + $0x18] sm:$0xff]  ;;  %vm250_vm0 = vcmask 261120  }
  0x6e   : > { %327 = vmatprep.mubr.f32.mxu0 %v885_v0  ;;  %432 = vmatprep.mubr.f32.mxu1 %v885_v0  ;;  %v238_v3 = vld [vmem:[%s205_s11] sm:$0xff]  ;;  %v598_v4 = vpack.c.bf16 %v241_v2, %v239_v1  ;;  %v240_v5 = vld [vmem:[%s205_s11 + $0x10] sm:$0xff]  ;;  %v243_v6 = vld [vmem:[%s205_s11 + $0x28] sm:$0xff]  ;;  %s584_s20 = sshll.u32 %s1097_s25, 5  ;;  %s597_s6 = sshll.u32 %s868_s15, 9 }
  0x6f   : > { %v245_v7 = vld [vmem:[%s205_s11 + $0x38] sm:$0xff]  ;;  %v600_v8 = vpack.c.bf16 %v240_v5, %v238_v3  ;;  %v242_v10 = vld [vmem:[%s205_s11 + $0x20] sm:$0xff]  ;;  %v244_v11 = vld [vmem:[%s205_s11 + $0x30] sm:$0xff]  ;;  %s235_s22 = scalar_lea.vmem [#allocation8], %s584_s20  ;;  %s1122_s26 = scalar_lea.hbm %s1174_s3, %s597_s6 }
  0x70   : > { %v602_v9 = vpack.c.bf16 %v245_v7, %v243_v6  ;;  %599 = vmatprep.subr.bf16.mxu0 %v598_v4  ;;  %v604_v12 = vpack.c.bf16 %v244_v11, %v242_v10  ;;  %v246_v13 = vld [vmem:[#allocation5] sm:$0xff]  ;;  %v247_v14 = vld [vmem:[#allocation5 + $0x8] sm:$0xff]  ;;  %v248_v15 = vld [vmem:[#allocation5 + $0x10] sm:$0xff]  ;;  %s465_s24 = sshll.u32 %s235_s22, 4  ;;  %s450_s30 = scalar_lea.sflag [#allocation4], %s1097_s25  ;;  %s1117_s24 = int_to_ptr.vmem [resolvable:$true] %s465_s24 }
  0x71   : > { %601 = vmatpush1.bf16.msra.mxu0 %v600_v8  ;;  %v249_v16 = vld [vmem:[#allocation5 + $0x18] sm:$0xff]  ;;  %v360_v37 = vld [vmem:[#allocation7] sm:$0xff]  ;;  %v361_v38 = vld [vmem:[#allocation7 + $0x8] sm:$0xff]  ;;  %s790_s4 = scalar_lea.vmem %s1117_s24, 512  ;;  %p1189_p2 = scmp.ne.s32.totalorder %s1185_s27, 0 }
  0x72   : > { %603 = vmatprep.subr.bf16.mxu0 %v602_v9  ;;  %p791_p8 = scmp.ne.s32.totalorder %s1117_s24, %s790_s4  ;;  %s886_s15 = smov [#allocation8]  }
  0x73   : > { %s794_s5 = sshll.u32 %s886_s15, 4  ;;  %s795_s5 = int_to_ptr.vmem [resolvable:$false] %s794_s5 }
  0x74   : > { %p792_p1 = pnand %p791_p8, %p1189_p2  ;;  %s796_s21 = scalar_lea.vmem %s795_s5, 1024 }
  0x75   : > { %605 = vmatpush1.bf16.msra.mxu0 %v604_v12  ;;  %p797_p3 = scmp.lt.s32.totalorder %s1117_s24, %s795_s5  ;;  %p798_p5 = scmp.lt.s32.totalorder %s796_s21, %s790_s4 }
  0x76   : > { %p793_p10 = pneg %p792_p1 }
  0x77   : > { %p799_p9 = por %p798_p5, %p797_p3 }
  0x78   : > { %585 = vmatmul.mubr.msk.f32.vlgmr.msra.gmra.mrb[0].mxu0 %vm250_vm0, %v246_v13 }
  0x79   : > { %333 = vmatprep.mubr.f32.mxu0 %v885_v0  ;;  %p800_p11 = pnand %p799_p9, %p793_p10 }
  0x7c   : > { %586 = vmatmul.mubr.msk.f32.gmra.mrb[2].mxu0 %vm250_vm0, %v247_v14 }
  0x7d   : > { %339 = vmatprep.mubr.f32.mxu0 %v885_v0 }
  0x80   : > { %587 = vmatmul.mubr.msk.f32.gmra.mrb[4].mxu0 %vm250_vm0, %v248_v15 }
  0x81   : > { %345 = vmatprep.mubr.f32.mxu0 %v885_v0 }
  0x84   : > { %588 = vmatmul.mubr.msk.f32.gmra.mrb[6].mxu0 %vm250_vm0, %v249_v16 }
 0x14b   : > { %v329_v17 = vpop.f32.mrb[0].mxu0 }
 0x14c   : > { %v331_v18 = vpop.f32.mrb[1].mxu0  ;;  %v352_v20 = vmax.f32 %v329_v17, 0.0 }
 0x14d   : > { %v353_v23 = vmax.f32 %v331_v18, 0.0 }
 0x14f   : > { %v335_v19 = vpop.f32.mrb[2].mxu0 }
 0x150   : > { %v354_v21 = vmax.f32 %v335_v19, 0.0  ;;  %v337_v22 = vpop.f32.mrb[3].mxu0 }
 0x151   : > { %v355_v24 = vmax.f32 %v337_v22, 0.0 }
 0x152   : > { %v608_v25 = vpack.c.bf16 %v354_v21, %v352_v20 }
 0x153   : > { %v341_v26 = vpop.f32.mrb[4].mxu0  ;;  %v606_v27 = vpack.c.bf16 %v355_v24, %v353_v23 }
 0x154   : > { %v343_v28 = vpop.f32.mrb[5].mxu0  ;;  %v356_v30 = vmax.f32 %v341_v26, 0.0 }
 0x155   : > { %607 = vmatprep.subr.bf16.mxu1 %v606_v27  ;;  %v357_v33 = vmax.f32 %v343_v28, 0.0 }
 0x156   : > { %609 = vmatpush1.bf16.msra.mxu1 %v608_v25 }
 0x157   : > { %v347_v29 = vpop.f32.mrb[6].mxu0 }
 0x158   : > { %v358_v31 = vmax.f32 %v347_v29, 0.0  ;;  %v349_v32 = vpop.f32.mrb[7].mxu0 }
 0x159   : > { %v359_v34 = vmax.f32 %v349_v32, 0.0 }
 0x15a   : > { %v612_v35 = vpack.c.bf16 %v358_v31, %v356_v30 }
 0x15b   : > { %v610_v36 = vpack.c.bf16 %v359_v34, %v357_v33 }
 0x15d   : > { %611 = vmatprep.subr.bf16.mxu1 %v610_v36 }
 0x15e   : > { %613 = vmatpush1.bf16.msra.mxu1 %v612_v35 }
 0x161   : > { %589 = vmatmul.mubr.msk.f32.vlgmr.msra.gmra.mrb[0].mxu1 %vm250_vm0, %v360_v37 }
 0x162   : > { %438 = vmatprep.mubr.f32.mxu1 %v885_v0 }
 0x165   : > { %590 = vmatmul.mubr.msk.f32.gmra.mrb[2].mxu1 %vm250_vm0, %v361_v38 }
 0x234   : > { %v434_v39 = vpop.f32.mrb[0].mxu1 }
 0x235   : > { %445 = vst [vmem:[%s235_s22] sm:$0xff] %v434_v39  ;;  %v436_v40 = vpop.f32.mrb[1].mxu1 }
 0x236   : > { %446 = vst [vmem:[%s235_s22 + $0x8] sm:$0xff] %v436_v40 }
 0x238   : > { %v440_v41 = vpop.f32.mrb[2].mxu1 }
 0x239   : > { %447 = vst [vmem:[%s235_s22 + $0x10] sm:$0xff] %v440_v41  ;;  %v442_v42 = vpop.f32.mrb[3].mxu1 }
 0x23a   : > { %448 = vst [vmem:[%s235_s22 + $0x18] sm:$0xff] %v442_v42 }
 0x23b   : > { %803 = shalt.err (!%p800_p11)
}
 0x23c   : > { %s804_s9 = scalar_lea.hbm %s1122_s26, 512  ;;  %s808_s29 = scalar_lea.hbm %s1174_s3, 1024 }
 0x23d   : > { %p805_p0 = scmp.ne.s32.totalorder %s1122_s26, %s804_s9  ;;  %p809_p6 = scmp.lt.u32.totalorder %s1122_s26, %s1174_s3 }
 0x23e   : > { %p810_p7 = scmp.lt.u32.totalorder %s808_s29, %s804_s9  ;;  %p812_p8 = scmp.lt.u32.totalorder %s804_s9, %s1122_s26 }
 0x23f   : > { %p806_p4 = pnand %p805_p0, %p1189_p2 }
 0x240   : > { %p811_p12 = por %p810_p7, %p809_p6 }
 0x241   : > { %p807_p13 = pneg %p806_p4 }
 0x242   : > { %p813_p1 = por %p812_p8, %p811_p12 }
 0x244   : > { %p814_p10 = pnand %p813_p1, %p807_p13 }
 0x246   : > { %817 = shalt.err (!%p814_p10)
}
 0x247   : > { %s887_s22 = smov 256   ;;  %s888_s6 = smov 16  }
 0x248   : > { %624 = dma.vmem_to_hbm [thread:$0]  (%p1189_p2), %s1117_s24, 512, %s1122_s26, %s450_s30, %s887_s22, %s887_s22, %s888_s6  }
 0x249 PF: > { %s480_s7 = sand.u32 1, %s856_s12   ;;  %p1190_p3 = scmp.ne.s32.totalorder %s1182_s23, 0 }
 0x24a   : > { %p1191_p5 = scmp.ge.s32.totalorder %s876_s17, 2  ;;  %s481_s8 = scalar_lea.sflag [#allocation4], %s480_s7 }
 0x24c   : > { %p638_p9 = pnand %p1191_p5, %p1190_p3 }
 0x24e   : > { %851 = dma.done.wait (!%p638_p9), %s481_s8, 512  }
 0x24f   : > { %853 = vsyncadd (!%p638_p9), %s481_s8, 4294966784  ;;  %s20_s17 = sadd.s32 1, %s876_s17   ;;  %s1192_s12 = smov %s860_s13 }
 0x250   : > { %p17_p11 = scmp.ge.s32.totalorder %s20_s17, 4   ;;  %s1193_s13 = smov %s864_s14 }
 0x251   : > { %s1194_s14 = smov %s1051_s18  ;;  %s1195_s15 = smov %s872_s16 }
 0x252   : > { %s1196_s16 = smov %s1198_s19  ;;  %19 = sbr.rel (!%p17_p11) target bundleno = 7 (0x7), region = 85 }
 0x259   :  { %486 = vsyncpa [#allocation3], 1 }
 0x25a   :  { %488 = vsyncpa [#allocation3 + $0x1], 1 }
 0x25b   :  { %489 = vsyncpa [#allocation6], 1 }
 0x25c   :  { %490 = vsyncpa [#allocation4], 1 }
 0x25d   :  { %492 = vsyncpa [#allocation4 + $0x1], 1 }

</bundles_post_ra>
